<compile_context>
chip_gen: v7x
topology: tpu7x:2x2x1
jax: 0.10.0
libtpu: 0.0.40
codegen_flags: <defaults>
</compile_context>

<pallas_src>
import jax
import jax.numpy as jnp
from jax.experimental import pallas as pl
from jax.experimental.pallas import tpu as pltpu


def _round_up(n, m):
    return ((n + m - 1) // m) * m


def _rbf_kernel(xaug_ref, caug_ref, nbeta_ref, o_ref):
    # xaug_ref:  (TB, Daug)  [x, ||x||^2, 1] (zero padded)
    # caug_ref:  (Daug, TO)  [-2*C^T ; 1 ; ||c||^2] (zero padded)
    # nbeta_ref: (1, TO)     -betas
    # o_ref:     (TB, TO)
    dist = jnp.dot(xaug_ref[...], caug_ref[...],
                   preferred_element_type=jnp.float32)      # (TB, TO) squared distance
    dist = jnp.maximum(dist, 0.0)                            # guard f32 cancellation
    o_ref[...] = jnp.exp(nbeta_ref[...] * dist).astype(o_ref.dtype)


def rbf_layer(x, centers, betas, *, tb=512, to=256):
    """Pallas RBF layer.

    x:       (B, *feat) -> flattened to (B, D)
    centers: (O, D)
    betas:   (1, O)
    returns: (B, O) float32
    """
    B = x.shape[0]
    x2 = x.reshape(B, -1).astype(jnp.float32)
    O, D = centers.shape
    assert x2.shape[1] == D, f"in_features mismatch: {x2.shape[1]} vs {D}"
    centers = centers.astype(jnp.float32)
    betas = betas.astype(jnp.float32).reshape(1, O)

    # Tile sizes: TB multiple of 8, TO multiple of 128 (lane-dense output).
    TB = min(tb, _round_up(B, 8))
    TO = min(to, _round_up(O, 128))
    B_pad = _round_up(B, TB)
    O_pad = _round_up(O, TO)
    D_aug = _round_up(D + 2, 128)   # room for ||x||^2 and constant-1 columns

    # Augmented LHS: [x, ||x||^2, 1], zero-padded.
    x_sq = jnp.sum(x2 * x2, axis=-1)                                   # (B,)
    x_aug = jnp.zeros((B_pad, D_aug), jnp.float32)
    x_aug = x_aug.at[:B, :D].set(x2)
    x_aug = x_aug.at[:B, D].set(x_sq)
    x_aug = x_aug.at[:B, D + 1].set(1.0)

    # Augmented RHS: [-2*C^T ; 1 ; ||c||^2], zero-padded.
    c_sq = jnp.sum(centers * centers, axis=-1)                          # (O,)
    c_aug = jnp.zeros((D_aug, O_pad), jnp.float32)
    c_aug = c_aug.at[:D, :O].set(-2.0 * centers.T)
    c_aug = c_aug.at[D, :O].set(1.0)
    c_aug = c_aug.at[D + 1, :O].set(c_sq)

    # Fold the negation of beta once in the wrapper.
    nbeta = jnp.zeros((1, O_pad), jnp.float32).at[:, :O].set(-betas)

    grid = (B_pad // TB, O_pad // TO)

    out = pl.pallas_call(
        _rbf_kernel,
        out_shape=jax.ShapeDtypeStruct((B_pad, O_pad), jnp.float32),
        grid=grid,
        in_specs=[
            pl.BlockSpec((TB, D_aug), lambda i, j: (i, 0)),
            pl.BlockSpec((D_aug, TO), lambda i, j: (0, j)),
            pl.BlockSpec((1, TO), lambda i, j: (0, j)),
        ],
        out_specs=pl.BlockSpec((TB, TO), lambda i, j: (i, j)),
        compiler_params=pltpu.CompilerParams(
            dimension_semantics=("parallel", "parallel"),
            vmem_limit_bytes=32 * 1024 * 1024,
        ),
        cost_estimate=pl.CostEstimate(
            flops=2 * B_pad * O_pad * D_aug,
            transcendentals=B_pad * O_pad,
            bytes_accessed=4 * (B_pad * D_aug + D_aug * O_pad + B_pad * O_pad),
        ),
    )(x_aug, c_aug, nbeta)

    return out[:B, :O]


def rbf_reference(x, centers, betas):
    B = x.shape[0]
    x2 = x.reshape(B, -1).astype(jnp.float32)                           # (B, D)
    diff = x2[:, None, :] - centers[None, :, :]                         # (B, O, D)
    dist = jnp.sum(diff * diff, axis=-1)                                # (B, O)
    return jnp.exp(-betas * dist)                                       # (B, O)


if __name__ == "__main__":
    key = jax.random.PRNGKey(0)
    k_x, k_c, k_b = jax.random.split(key, 3)

    batch = 8
    in_features = 16        # flattened from (4, 4) spatial input
    out_features = 32

    # Deterministic synthetic parameters (module __init__ only declares shapes).
    x = jax.random.normal(k_x, (batch, 4, 4), dtype=jnp.float32)
    centers = jax.random.normal(k_c, (out_features, in_features), dtype=jnp.float32)
    betas = jax.random.uniform(k_b, (1, out_features), dtype=jnp.float32,
                               minval=0.1, maxval=1.0)

    out = rbf_layer(x, centers, betas)
    out = jax.block_until_ready(out)

    ref = rbf_reference(x, centers, betas)
    assert out.shape == (batch, out_features), out.shape
    assert jnp.allclose(out, ref, atol=1e-4, rtol=1e-4), (
        f"max abs err {jnp.max(jnp.abs(out - ref))}"
    )

    print("KERNEL_OK")
</pallas_src>

<mosaic_0001>
module attributes {stable_mosaic.version = 11 : i64} {
  func.func @_rbf_kernel(%arg0: i32, %arg1: i32, %arg2: memref<8x128xf32, #tpu.memory_space<vmem>>, %arg3: memref<128x128xf32, #tpu.memory_space<vmem>>, %arg4: memref<1x128xf32, #tpu.memory_space<vmem>>, %arg5: memref<8x128xf32, #tpu.memory_space<vmem>>) attributes {dimension_semantics = [#tpu.dimension_semantics<parallel>, #tpu.dimension_semantics<parallel>], iteration_bounds = array<i64: 1, 1>, scalar_prefetch = 0 : i64, scratch_operands = 0 : i64, tpu.core_type = #tpu.core_type<tc>, window_params = [{transform_indices = @transform_0, window_bounds = array<i64: 8, 128>}, {transform_indices = @transform_1, window_bounds = array<i64: 128, 128>}, {transform_indices = @transform_2, window_bounds = array<i64: 1, 128>}, {transform_indices = @transform_3, window_bounds = array<i64: 8, 128>}]} {
    %c0 = arith.constant 0 : index
    %c0_0 = arith.constant 0 : index
    %0 = vector.load %arg2[%c0, %c0_0] : memref<8x128xf32, #tpu.memory_space<vmem>>, vector<8x128xf32>
    %c0_1 = arith.constant 0 : index
    %c0_2 = arith.constant 0 : index
    %1 = vector.load %arg3[%c0_1, %c0_2] : memref<128x128xf32, #tpu.memory_space<vmem>>, vector<128x128xf32>
    %cst = arith.constant dense<0.000000e+00> : vector<8x128xf32>
    %2 = tpu.matmul %0, %1, %cst {dimension_numbers = #tpu.dot_dimension_numbers<[1], [0], [0], [1], [0, 0, 1, 1], [], []>} : vector<8x128xf32>, vector<128x128xf32>, vector<8x128xf32> -> vector<8x128xf32>
    %cst_3 = arith.constant 0.000000e+00 : f32
    %3 = vector.broadcast %cst_3 : f32 to vector<8x128xf32>
    %4 = arith.maximumf %2, %3 : vector<8x128xf32>
    %c0_4 = arith.constant 0 : index
    %c0_5 = arith.constant 0 : index
    %5 = vector.load %arg4[%c0_4, %c0_5] : memref<1x128xf32, #tpu.memory_space<vmem>>, vector<1x128xf32>
    %6 = vector.broadcast %5 : vector<1x128xf32> to vector<8x128xf32>
    %7 = arith.mulf %6, %4 : vector<8x128xf32>
    %8 = math.exp %7 : vector<8x128xf32>
    %c0_6 = arith.constant 0 : index
    %c0_7 = arith.constant 0 : index
    %9 = vector.load %arg5[%c0_6, %c0_7] : memref<8x128xf32, #tpu.memory_space<vmem>>, vector<8x128xf32>
    tpu.vector_store %arg5[%c0_6, %c0_7], %8 {strides = array<i32>} : memref<8x128xf32, #tpu.memory_space<vmem>>, vector<8x128xf32>,
    return
  }
  func.func @transform_0(%arg0: i32, %arg1: i32) -> (i32, i32) {
    %c0_i32 = arith.constant 0 : i32
    %c0_i32_0 = arith.constant 0 : i32
    return %arg0, %c0_i32 : i32, i32
  }
  func.func @transform_1(%arg0: i32, %arg1: i32) -> (i32, i32) {
    %c0_i32 = arith.constant 0 : i32
    %c0_i32_0 = arith.constant 0 : i32
    return %c0_i32, %arg1 : i32, i32
  }
  func.func @transform_2(%arg0: i32, %arg1: i32) -> (i32, i32) {
    %c0_i32 = arith.constant 0 : i32
    %c0_i32_0 = arith.constant 0 : i32
    return %c0_i32, %arg1 : i32, i32
  }
  func.func @transform_3(%arg0: i32, %arg1: i32) -> (i32, i32) {
    %c0_i32 = arith.constant 0 : i32
    return %arg0, %arg1 : i32, i32
  }
}

</mosaic_0001>

<bundles_post_ra>
// kernel: tpu_custom_call.1
= control target key start
LH: loop header
LB: loop body
LE: loop exit
PB: predicated region body
PF: predicated region fallthrough
CT: control target
= control target key end

     0   :  { %8 = vsyncpa [#allocation3], 0  ;;  %s389_s0 = inlined_call_operand.hbm [shape: f32[8,128], index: 0, kind: input, shape index: {}]   ;;  %s390_s1 = inlined_call_operand.hbm [shape: f32[128,128], index: 1, kind: input, shape index: {}]   ;;  %s391_s2 = inlined_call_operand.vmem [shape: f32[1,128], index: 2, kind: input, shape index: {}]   ;;  %s392_s3 = inlined_call_operand.hbm [shape: f32[8,128], index: 3, kind: output, shape index: {}]  }
   0x1   :  { %9 = vsyncpa [#allocation6], 0 }
   0x2   :  { %10 = vsyncpa [#allocation4], 0  ;;  %s315_s12 = smov [#allocation2]   ;;  %s316_s14 = smov [#allocation5]  }
   0x3   :  { %s17_s13 = sshll.u32 %s315_s12, 4  ;;  %s26_s15 = sshll.u32 %s316_s14, 4  ;;  %s18_s13 = int_to_ptr.vmem [resolvable:$true] %s17_s13  ;;  %s343_s15 = int_to_ptr.vmem [resolvable:$true] %s26_s15 }
   0x4   :  { %s243_s18 = scalar_lea.hbm %s389_s0, 128 }
   0x5   :  { %p244_p0 = scmp.ne.s32.totalorder %s389_s0, %s243_s18  ;;  %p247_p1 = scmp.lt.u32.totalorder %s243_s18, %s389_s0 }
   0x7   :  { %p249_p2 = pnand %p247_p1, %p244_p0 }
   0x9   :  { %252 = shalt.err (!%p249_p2)
}
   0xa   :  { %s253_s23 = scalar_lea.vmem %s18_s13, 128  ;;  %p258_p4 = scmp.lt.s32.totalorder %s18_s13, %s18_s13 }
   0xb   :  { %p254_p3 = scmp.ne.s32.totalorder %s18_s13, %s253_s23  ;;  %p259_p5 = scmp.lt.s32.totalorder %s253_s23, %s253_s23 }
   0xd   :  { %p260_p6 = por %p259_p5, %p258_p4 }
   0xf   :  { %p261_p7 = pnand %p260_p6, %p254_p3 }
  0x11   :  { %264 = shalt.err (!%p261_p7)
}
  0x12   :  { %20 = dma.hbm_to_vmem [thread:$0]  %s389_s0, 128, %s18_s13, [#allocation3]  }
  0x13   :  { %s265_s28 = scalar_lea.hbm %s390_s1, 2048 }
  0x14   :  { %p266_p8 = scmp.ne.s32.totalorder %s390_s1, %s265_s28  ;;  %p269_p9 = scmp.lt.u32.totalorder %s265_s28, %s390_s1 }
  0x16   :  { %p271_p10 = pnand %p269_p9, %p266_p8 }
  0x18   :  { %274 = shalt.err (!%p271_p10)
}
  0x19   :  { %s275_s6 = scalar_lea.vmem %s343_s15, 2048  ;;  %p280_p12 = scmp.lt.s32.totalorder %s343_s15, %s343_s15 }
  0x1a   :  { %p276_p11 = scmp.ne.s32.totalorder %s343_s15, %s275_s6  ;;  %p281_p13 = scmp.lt.s32.totalorder %s275_s6, %s275_s6 }
  0x1c   :  { %p282_p0 = por %p281_p13, %p280_p12 }
  0x1e   :  { %p283_p1 = pnand %p282_p0, %p276_p11 }
  0x20   :  { %286 = shalt.err (!%p283_p1)
}
  0x21   :  { %s317_s0 = smov 128   ;;  %s318_s7 = smov 8  }
  0x22   :  { %32 = dma.hbm_to_vmem [thread:$0]  %s390_s1, 2048, %s343_s15, [#allocation6], %s317_s0, %s317_s0, %s318_s7  }
  0x23   :  { %309 = dma.done.wait [#allocation3], 128  }
  0x24   :  { %310 = vsyncadd [#allocation3], 4294967168 }
  0x25   :  { %311 = dma.done.wait [#allocation6], 2048  }
  0x26   :  { %312 = vsyncadd [#allocation6], 4294965248  ;;  %v319_v0 = vmov 0.0|0.0   ;;  %vm320_vm0 = vmmov 0   ;;  %v321_v1 = vmov 0.0   ;;  %v42_v2 = vld [vmem:[#allocation5] sm:$0xff] }
  0x27   :  { %209 = vmatprep.subr.bf16.mxu0 %v319_v0  ;;  %206 = vmatprep.mubr.msk.f32.mxu0 %vm320_vm0, %v321_v1  ;;  %v43_v3 = vld [vmem:[#allocation5 + $0x8] sm:$0xff]  ;;  %v44_v4 = vld [vmem:[#allocation5 + $0x10] sm:$0xff]  ;;  %v45_v6 = vld [vmem:[#allocation5 + $0x18] sm:$0xff]  ;;  %s322_s11 = smov [#allocation7]  }
  0x28   :  { %v210_v5 = vpack.c.bf16 %v43_v3, %v42_v2  ;;  %v213_v7 = vpack.c.bf16 %v45_v6, %v44_v4  ;;  %v46_v8 = vld [vmem:[#allocation5 + $0x20] sm:$0xff]  ;;  %v47_v9 = vld [vmem:[#allocation5 + $0x28] sm:$0xff]  ;;  %v48_v11 = vld [vmem:[#allocation5 + $0x30] sm:$0xff]  ;;  %s146_s12 = sshll.u32 %s322_s11, 4  ;;  %s147_s12 = int_to_ptr.vmem [resolvable:$true] %s146_s12 }
  0x29   :  { %v216_v10 = vpack.c.bf16 %v47_v9, %v46_v8  ;;  %v49_v12 = vld [vmem:[#allocation5 + $0x38] sm:$0xff]  ;;  %v50_v14 = vld [vmem:[#allocation5 + $0x40] sm:$0xff]  ;;  %v51_v15 = vld [vmem:[#allocation5 + $0x48] sm:$0xff]  ;;  %s287_s13 = scalar_lea.vmem %s147_s12, 128  ;;  %p292_p3 = scmp.lt.s32.totalorder %s147_s12, %s147_s12 }
  0x2a   :  { %211 = vmatpush3.bf16.msra.mxu0 %v210_v5  ;;  %v219_v13 = vpack.c.bf16 %v49_v12, %v48_v11  ;;  %v222_v16 = vpack.c.bf16 %v51_v15, %v50_v14  ;;  %v52_v17 = vld [vmem:[#allocation5 + $0x50] sm:$0xff]  ;;  %v53_v18 = vld [vmem:[#allocation5 + $0x58] sm:$0xff]  ;;  %v54_v20 = vld [vmem:[#allocation5 + $0x60] sm:$0xff]  ;;  %p288_p2 = scmp.ne.s32.totalorder %s147_s12, %s287_s13  ;;  %p293_p4 = scmp.lt.s32.totalorder %s287_s13, %s287_s13 }
  0x2b   :  { %212 = vmatprep.subr.bf16.mxu0 %v319_v0  ;;  %v225_v19 = vpack.c.bf16 %v53_v18, %v52_v17  ;;  %v55_v21 = vld [vmem:[#allocation5 + $0x68] sm:$0xff]  ;;  %v56_v23 = vld [vmem:[#allocation5 + $0x70] sm:$0xff]  ;;  %v57_v24 = vld [vmem:[#allocation5 + $0x78] sm:$0xff] }
  0x2c   :  { %v228_v22 = vpack.c.bf16 %v55_v21, %v54_v20  ;;  %v231_v25 = vpack.c.bf16 %v57_v24, %v56_v23  ;;  %v41_v26 = vld [vmem:[#allocation2] sm:$0xff]  ;;  %p294_p5 = por %p293_p4, %p292_p3 }
  0x2d   :  { %v156_v28 = vld [vmem:[%s391_s2] ss:$0 sm:$0xff] }
  0x2e   :  { %214 = vmatpush3.bf16.msra.mxu0 %v213_v7  ;;  %p295_p6 = pnand %p294_p5, %p288_p2 }
  0x2f   :  { %215 = vmatprep.subr.bf16.mxu0 %v319_v0 }
  0x32   :  { %217 = vmatpush3.bf16.msra.mxu0 %v216_v10 }
  0x33   :  { %218 = vmatprep.subr.bf16.mxu0 %v319_v0 }
  0x36   :  { %220 = vmatpush3.bf16.msra.mxu0 %v219_v13 }
  0x37   :  { %221 = vmatprep.subr.bf16.mxu0 %v319_v0 }
  0x3a   :  { %223 = vmatpush3.bf16.msra.mxu0 %v222_v16 }
  0x3b   :  { %224 = vmatprep.subr.bf16.mxu0 %v319_v0 }
  0x3e   :  { %226 = vmatpush3.bf16.msra.mxu0 %v225_v19 }
  0x3f   :  { %227 = vmatprep.subr.bf16.mxu0 %v319_v0 }
  0x42   :  { %229 = vmatpush3.bf16.msra.mxu0 %v228_v22 }
  0x43   :  { %230 = vmatprep.subr.bf16.mxu0 %v319_v0 }
  0x46   :  { %232 = vmatpush3.bf16.msra.mxu0 %v231_v25 }
  0x49   :  { %207 = vmatmul.mubr.f32.vlgmr.msra.gmra.mrb[0].mxu0 %v41_v26 }
 0x11c   :  { %v124_v27 = vpop.f32.mrb[0].mxu0 }
 0x11d   :  { %v128_v29 = vmax.f32 %v124_v27, 0.0  ;;  %v208_v30 = vpop.f32.mrb[1].mxu0 }
 0x11f   :  { %v136_v31 = vmul.f32 %v156_v28, %v128_v29 }
 0x121   :  { %v137_v32 = vmul.f32 1.442695, %v136_v31 }
 0x123   :  { %241 = vpow2.f32 %v137_v32 }
 0x12d   :  { %v242_v33 = vpop.eup %241 }
 0x12e   :  { %139 = vst [vmem:[#allocation7] sm:$0xff] %v242_v33 }
 0x12f   :  { %298 = shalt.err (!%p295_p6)
}
 0x130   :  { %s299_s2 = scalar_lea.hbm %s392_s3, 128 }
 0x131   :  { %p300_p7 = scmp.ne.s32.totalorder %s392_s3, %s299_s2  ;;  %p303_p8 = scmp.lt.u32.totalorder %s299_s2, %s392_s3 }
 0x133   :  { %p305_p9 = pnand %p303_p8, %p300_p7 }
 0x135   :  { %308 = shalt.err (!%p305_p9)
}
 0x136   :  { %149 = dma.vmem_to_hbm [thread:$0]  %s147_s12, 128, %s392_s3, [#allocation4]  }
 0x137   :  { %313 = dma.done.wait [#allocation4], 128  }
 0x138   :  { %314 = vsyncadd [#allocation4], 4294967168 }
 0x139   :  { %153 = vsyncpa [#allocation3], 1 }
 0x13a   :  { %154 = vsyncpa [#allocation6], 1 }
 0x13b   :  { %155 = vsyncpa [#allocation4], 1 }

</bundles_post_ra>
